<compile_context>
chip_gen: v7x
topology: tpu7x:2x2x1
jax: 0.10.0
libtpu: 0.0.40
codegen_flags: <defaults>
</compile_context>

<pallas_src>
import functools

import jax
import jax.numpy as jnp
from jax import lax
from jax.experimental import pallas as pl
from jax.experimental.pallas import tpu as pltpu


# ---------------------------------------------------------------------------
# VMEM limit: leave headroom on v7x (64 MiB physical); 64 MiB override on v5e/v6e.
# ---------------------------------------------------------------------------

def _vmem_limit_bytes():
    cap = 128 * 1024 * 1024
    try:
        info = pltpu.get_tpu_info()
        cap = int(getattr(info, "vmem_capacity_bytes", cap))
    except Exception:
        pass
    return min(64 * 1024 * 1024, (cap * 3) // 4)


_VMEM_LIMIT = _vmem_limit_bytes()


def _choose_tile(dim, target, align):
    """Largest aligned tile <= target that divides dim (falls back to the full dim)."""
    if dim <= target:
        return dim
    t = (min(dim, target) // align) * align
    while t > align and dim % t != 0:
        t -= align
    if t <= 0 or dim % t != 0:
        # TODO(synk): pad M/N to a multiple of `align` (masked epilogue store) for
        #             non-divisible production dims (e.g. vocab = 50265).
        return dim
    return t


# ---------------------------------------------------------------------------
# Encoder: Linear + ReLU with in-kernel pad masking (K fits one block -> no K axis)
# ---------------------------------------------------------------------------

def _enc_linear_relu_kernel(len_ref, x_ref, w_ref, b_ref, o_ref):
    # len_ref : (B,) int32 SMEM (scalar prefetch)
    # x_ref   : (S, D)  bf16 (one batch row-panel)
    # w_ref   : (D, tn) bf16
    # b_ref   : (1, tn) f32
    # o_ref   : (S, tn) bf16
    b = pl.program_id(0)
    y = jnp.dot(x_ref[...], w_ref[...], preferred_element_type=jnp.float32) + b_ref[...]
    y = jnp.maximum(y, 0.0)                                   # f32 epilogue (VPU)
    s_idx = lax.broadcasted_iota(jnp.int32, y.shape, 0)       # sequence position per row
    o_ref[...] = jnp.where(s_idx < len_ref[b], y, 0.0).astype(o_ref.dtype)


def _encoder(params, src_tokens, src_lengths):
    src_emb = params["enc_embed"][src_tokens]                 # (B, S, D) bf16 gather
    B, S, D = src_emb.shape
    w = params["enc_w"]                                       # (D, N) bf16
    N = w.shape[1]
    bias = params["enc_b"].astype(jnp.float32).reshape(1, N)
    tn = _choose_tile(N, 256, 128)

    enc_out = pl.pallas_call(
        _enc_linear_relu_kernel,
        grid_spec=pltpu.PrefetchScalarGridSpec(
            num_scalar_prefetch=1,
            grid=(B, N // tn),
            in_specs=[
                pl.BlockSpec((None, S, D), lambda b, j, lens: (b, 0, 0)),
                pl.BlockSpec((D, tn), lambda b, j, lens: (0, j)),
                pl.BlockSpec((1, tn), lambda b, j, lens: (0, j)),
            ],
            out_specs=pl.BlockSpec((None, S, tn), lambda b, j, lens: (b, 0, j)),
        ),
        out_shape=jax.ShapeDtypeStruct((B, S, N), jnp.bfloat16),  # consumed as bf16 keys/values
        compiler_params=pltpu.CompilerParams(
            dimension_semantics=("parallel", "parallel"),
            vmem_limit_bytes=_VMEM_LIMIT),
    )(src_lengths, src_emb, w, bias)
    return enc_out


# ---------------------------------------------------------------------------
# Decoder part 1: flash-style masked cross-attention (online softmax over S tiles)
# ---------------------------------------------------------------------------

def _flash_cross_attn_kernel(len_ref, q_ref, kv_ref, o_ref, m_sc, l_sc, acc_sc,
                             *, tk, scale):
    # q_ref : (T, D)  bf16 decoder embeddings (queries + residual source)
    # kv_ref: (tk, D) bf16 encoder outputs (keys == values), one S tile
    b = pl.program_id(0)
    kvi = pl.program_id(1)

    @pl.when(kvi == 0)
    def _():
        m_sc[...] = jnp.full_like(m_sc, -jnp.inf)
        l_sc[...] = jnp.zeros_like(l_sc)
        acc_sc[...] = jnp.zeros_like(acc_sc)

    q = q_ref[...]
    kv = kv_ref[...]
    # contract D with D directly (no materialized kv transpose)
    s = lax.dot_general(q, kv, (((1,), (1,)), ((), ())),
                        preferred_element_type=jnp.float32) * scale        # (T, tk)
    kpos = kvi * tk + lax.broadcasted_iota(jnp.int32, s.shape, 1)
    s = jnp.where(kpos < len_ref[b], s, -1e9)   # finite mask: fully padded rows stay NaN-free

    m_prev = m_sc[...]
    m_new = jnp.maximum(m_prev, s.max(axis=-1, keepdims=True))
    alpha = jnp.exp(m_prev - m_new)
    p = jnp.exp(s - m_new)                                                  # f32 softmax stats
    l_sc[...] = alpha * l_sc[...] + p.sum(axis=-1, keepdims=True)
    acc_sc[...] = alpha * acc_sc[...] + jnp.dot(
        p.astype(jnp.bfloat16), kv, preferred_element_type=jnp.float32)
    m_sc[...] = m_new

    @pl.when(kvi == pl.num_programs(1) - 1)
    def _():
        ctx = acc_sc[...] * pl.reciprocal(l_sc[...], approx=True)           # EUP reciprocal
        o_ref[...] = (q.astype(jnp.float32) + ctx).astype(o_ref.dtype)      # residual, bf16 out


# ---------------------------------------------------------------------------
# Decoder part 2: weight-streaming vocab projection (single M/K block, tiled over N)
# ---------------------------------------------------------------------------

def _linear_bias_kernel(x_ref, w_ref, b_ref, o_ref):
    o_ref[...] = (jnp.dot(x_ref[...], w_ref[...], preferred_element_type=jnp.float32)
                  + b_ref[...]).astype(o_ref.dtype)


def _weight_streaming_linear(x, w, b, *, tm=256, tn=512):
    """y = x @ w + b, 2-D grid (M tiles, N tiles), full-K blocks (no accumulator scratch)."""
    M, K = x.shape
    Kw, N = w.shape
    assert K == Kw
    # K = D = 128 here: a single K block; no acc_ref / pl.when init-finalize machinery.
    # TODO(synk): add a K grid axis + f32 accumulator if the embed dim grows beyond ~2048.
    assert K <= 2048
    tm = _choose_tile(M, tm, 8)       # sublane-aligned
    tn = _choose_tile(N, tn, 128)     # lane-dense, large tiles to stream W once in big DMAs
    bias = b.astype(jnp.float32).reshape(1, N)

    return pl.pallas_call(
        _linear_bias_kernel,
        grid_spec=pltpu.PrefetchScalarGridSpec(
            num_scalar_prefetch=0,
            grid=(M // tm, N // tn),
            in_specs=[
                pl.BlockSpec((tm, K), lambda i, j: (i, 0)),
                pl.BlockSpec((K, tn), lambda i, j: (0, j)),
                pl.BlockSpec((1, tn), lambda i, j: (0, j)),
            ],
            out_specs=pl.BlockSpec((tm, tn), lambda i, j: (i, j)),
        ),
        out_shape=jax.ShapeDtypeStruct((M, N), jnp.float32),
        compiler_params=pltpu.CompilerParams(
            dimension_semantics=("parallel", "parallel"),
            vmem_limit_bytes=_VMEM_LIMIT),
    )(x.astype(jnp.bfloat16), w, bias)


def _decoder(params, prev_output_tokens, enc_out, src_lengths):
    tgt_emb = params["dec_embed"][prev_output_tokens]          # (B, T, D) bf16 gather
    B, T, D = tgt_emb.shape
    S = enc_out.shape[1]
    V = params["out_w"].shape[1]
    tk = _choose_tile(S, 512, 8)
    scale = 1.0 / float(D) ** 0.5

    feat = pl.pallas_call(
        functools.partial(_flash_cross_attn_kernel, tk=tk, scale=scale),
        grid_spec=pltpu.PrefetchScalarGridSpec(
            num_scalar_prefetch=1,
            grid=(B, S // tk),
            in_specs=[
                pl.BlockSpec((None, T, D), lambda b, k, lens: (b, 0, 0)),
                pl.BlockSpec((None, tk, D), lambda b, k, lens: (b, k, 0)),
            ],
            out_specs=pl.BlockSpec((None, T, D), lambda b, k, lens: (b, 0, 0)),
            scratch_shapes=[
                pltpu.VMEM((T, 1), jnp.float32),   # running max
                pltpu.VMEM((T, 1), jnp.float32),   # running denom
                pltpu.VMEM((T, D), jnp.float32),   # running context
            ],
        ),
        out_shape=jax.ShapeDtypeStruct((B, T, D), jnp.bfloat16),  # consumed as bf16 matmul lhs
        compiler_params=pltpu.CompilerParams(
            dimension_semantics=("parallel", "arbitrary"),
            vmem_limit_bytes=_VMEM_LIMIT),
    )(src_lengths, tgt_emb, enc_out)

    # TODO(synk): fuse this projection with the attention epilogue (feat in VMEM scratch)
    #             to drop one launch + one (B,T,D) HBM round trip at tiny B*T.
    logits = _weight_streaming_linear(feat.reshape(B * T, D),
                                      params["out_w"], params["out_b"])
    logits = logits.reshape(B, T, V)
    # fairseq decoders return (logits, extra_dict)
    return logits, {"attn": [None], "inner_states": None}


# ---------------------------------------------------------------------------
# FairseqEncoderDecoderModel.forward equivalent
# ---------------------------------------------------------------------------

@jax.jit
def fairseq_encoder_decoder_forward(params, src_tokens, src_lengths, prev_output_tokens):
    enc_out = _encoder(params, src_tokens, src_lengths)
    return _decoder(params, prev_output_tokens, enc_out, src_lengths)


# TODO(synk): checkpoint plumbing (load_state_dict / upgrade_state_dict / from_pretrained)
#             and make_generation_fast_ / prepare_for_onnx_export_ have no kernel-level
#             equivalent; omitted.


def init_params(key, vocab=512, embed=128):
    ks = jax.random.split(key, 4)
    scale = 0.02
    # bf16 embeddings + weights (MXU-native, halves gather/weight HBM traffic); f32 biases.
    return {
        "enc_embed": (scale * jax.random.normal(ks[0], (vocab, embed), jnp.float32)
                      ).astype(jnp.bfloat16),
        "dec_embed": (scale * jax.random.normal(ks[1], (vocab, embed), jnp.float32)
                      ).astype(jnp.bfloat16),
        "enc_w": (scale * jax.random.normal(ks[2], (embed, embed), jnp.float32)
                  ).astype(jnp.bfloat16),
        "enc_b": jnp.zeros((embed,), jnp.float32),
        # TODO(synk): optional fp8 out_w (+ per-column scales) on v7x / int8 on v5e-v6e.
        "out_w": (scale * jax.random.normal(ks[3], (embed, vocab), jnp.float32)
                  ).astype(jnp.bfloat16),
        "out_b": jnp.zeros((vocab,), jnp.float32),
    }


if __name__ == "__main__":
    key = jax.random.PRNGKey(0)
    # D=128 keeps every output lane-dense; V=512 exercises the weight-streaming projection.
    B, S, T, V, D = 2, 8, 8, 512, 128

    params = init_params(key, vocab=V, embed=D)

    k1, k2 = jax.random.split(key)
    src_tokens = jax.random.randint(k1, (B, S), 0, V, dtype=jnp.int32)
    prev_output_tokens = jax.random.randint(k2, (B, T), 0, V, dtype=jnp.int32)
    src_lengths = jnp.array([S, S - 3], dtype=jnp.int32)

    logits, extra = fairseq_encoder_decoder_forward(
        params, src_tokens, src_lengths, prev_output_tokens
    )
    logits = jax.block_until_ready(logits)

    assert logits.shape == (B, T, V), logits.shape
    assert logits.dtype == jnp.float32
    assert bool(jnp.all(jnp.isfinite(logits)))
    print("KERNEL_OK")
</pallas_src>

<mosaic_0001>
module attributes {stable_mosaic.version = 11 : i64} {
  func.func @_flash_cross_attn_kernel(%arg0: i32, %arg1: i32, %arg2: memref<2xi32, #tpu.memory_space<smem>>, %arg3: memref<1x8x128xbf16, #tpu.memory_space<vmem>>, %arg4: memref<1x8x128xbf16, #tpu.memory_space<vmem>>, %arg5: memref<1x8x128xbf16, #tpu.memory_space<vmem>>, %arg6: memref<8x1xf32, #tpu.memory_space<vmem>>, %arg7: memref<8x1xf32, #tpu.memory_space<vmem>>, %arg8: memref<8x128xf32, #tpu.memory_space<vmem>>) attributes {dimension_semantics = [#tpu.dimension_semantics<parallel>, #tpu.dimension_semantics<arbitrary>], iteration_bounds = array<i64: 2, 1>, scalar_prefetch = 1 : i64, scratch_operands = 3 : i64, tpu.core_type = #tpu.core_type<tc>, window_params = [{transform_indices = @transform_0, window_bounds = array<i64: 1, 8, 128>}, {transform_indices = @transform_1, window_bounds = array<i64: 1, 8, 128>}, {transform_indices = @transform_2, window_bounds = array<i64: 1, 8, 128>}]} {
    %c0_i32 = arith.constant 0 : i32
    %0 = arith.cmpi eq, %arg1, %c0_i32 : i32
    %1 = arith.extui %0 : i1 to i32
    %c0_i32_0 = arith.constant 0 : i32
    %2 = arith.cmpi ne, %1, %c0_i32_0 : i32
    scf.if %2 {
      %cst_25 = arith.constant 0xFF800000 : f32
      %46 = vector.broadcast %cst_25 : f32 to vector<8x1xf32>
      %c0_26 = arith.constant 0 : index
      %c0_27 = arith.constant 0 : index
      %47 = vector.load %arg6[%c0_26, %c0_27] : memref<8x1xf32, #tpu.memory_space<vmem>>, vector<8x1xf32>
      tpu.vector_store %arg6[%c0_26, %c0_27], %46 {strides = array<i32>} : memref<8x1xf32, #tpu.memory_space<vmem>>, vector<8x1xf32>,
      %cst_28 = arith.constant 0.000000e+00 : f32
      %48 = vector.broadcast %cst_28 : f32 to vector<8x1xf32>
      %c0_29 = arith.constant 0 : index
      %c0_30 = arith.constant 0 : index
      %49 = vector.load %arg7[%c0_29, %c0_30] : memref<8x1xf32, #tpu.memory_space<vmem>>, vector<8x1xf32>
      tpu.vector_store %arg7[%c0_29, %c0_30], %48 {strides = array<i32>} : memref<8x1xf32, #tpu.memory_space<vmem>>, vector<8x1xf32>,
      %cst_31 = arith.constant 0.000000e+00 : f32
      %50 = vector.broadcast %cst_31 : f32 to vector<8x128xf32>
      %c0_32 = arith.constant 0 : index
      %c0_33 = arith.constant 0 : index
      %51 = vector.load %arg8[%c0_32, %c0_33] : memref<8x128xf32, #tpu.memory_space<vmem>>, vector<8x128xf32>
      tpu.vector_store %arg8[%c0_32, %c0_33], %50 {strides = array<i32>} : memref<8x128xf32, #tpu.memory_space<vmem>>, vector<8x128xf32>,
    } else {
    }
    %c0 = arith.constant 0 : index
    %c0_1 = arith.constant 0 : index
    %c0_2 = arith.constant 0 : index
    %3 = vector.load %arg3[%c0, %c0_1, %c0_2] : memref<1x8x128xbf16, #tpu.memory_space<vmem>>, vector<1x8x128xbf16>
    %4 = vector.shape_cast %3 : vector<1x8x128xbf16> to vector<8x128xbf16>
    %c0_3 = arith.constant 0 : index
    %c0_4 = arith.constant 0 : index
    %c0_5 = arith.constant 0 : index
    %5 = vector.load %arg4[%c0_3, %c0_4, %c0_5] : memref<1x8x128xbf16, #tpu.memory_space<vmem>>, vector<1x8x128xbf16>
    %6 = vector.shape_cast %5 : vector<1x8x128xbf16> to vector<8x128xbf16>
    %cst = arith.constant dense<0.000000e+00> : vector<8x8xf32>
    %7 = tpu.matmul %4, %6, %cst {dimension_numbers = #tpu.dot_dimension_numbers<[1], [1], [0], [0], [0, 0, 1, 0], [], []>} : vector<8x128xbf16>, vector<8x128xbf16>, vector<8x8xf32> -> vector<8x8xf32>
    %cst_6 = arith.constant 0.0883883461 : f32
    %8 = vector.broadcast %cst_6 : f32 to vector<8x8xf32>
    %9 = arith.mulf %7, %8 : vector<8x8xf32>
    %c8_i32 = arith.constant 8 : i32
    %10 = arith.muli %arg1, %c8_i32 : i32
    %11 = tpu.iota {dimensions = array<i32: 1>} : vector<8x8xi32>
    %12 = vector.broadcast %10 : i32 to vector<8x8xi32>
    %13 = arith.addi %12, %11 : vector<8x8xi32>
    %14 = arith.index_cast %arg0 : i32 to index
    %15 = memref.load %arg2[%14] : memref<2xi32, #tpu.memory_space<smem>>
    %16 = vector.broadcast %15 : i32 to vector<8x8xi32>
    %17 = arith.cmpi slt, %13, %16 : vector<8x8xi32>
    %cst_7 = arith.constant -1.000000e+09 : f32
    %18 = vector.broadcast %cst_7 : f32 to vector<8x8xf32>
    %19 = arith.select %17, %9, %18 : vector<8x8xi1>, vector<8x8xf32>
    %c0_8 = arith.constant 0 : index
    %c0_9 = arith.constant 0 : index
    %20 = vector.load %arg6[%c0_8, %c0_9] : memref<8x1xf32, #tpu.memory_space<vmem>>, vector<8x1xf32>
    %cst_10 = arith.constant dense<0xFF800000> : vector<8xf32>
    %21 = vector.multi_reduction <maximumf>, %19, %cst_10 [1] : vector<8x8xf32> to vector<8xf32>
    %22 = vector.shape_cast %21 : vector<8xf32> to vector<8x1xf32>
    %23 = arith.maximumf %20, %22 : vector<8x1xf32>
    %24 = arith.subf %20, %23 : vector<8x1xf32>
    %25 = math.exp %24 : vector<8x1xf32>
    %26 = vector.broadcast %23 : vector<8x1xf32> to vector<8x8xf32>
    %27 = arith.subf %19, %26 : vector<8x8xf32>
    %28 = math.exp %27 : vector<8x8xf32>
    %c0_11 = arith.constant 0 : index
    %c0_12 = arith.constant 0 : index
    %29 = vector.load %arg7[%c0_11, %c0_12] : memref<8x1xf32, #tpu.memory_space<vmem>>, vector<8x1xf32>
    %30 = arith.mulf %25, %29 : vector<8x1xf32>
    %cst_13 = arith.constant dense<0.000000e+00> : vector<8xf32>
    %31 = vector.multi_reduction <add>, %28, %cst_13 [1] : vector<8x8xf32> to vector<8xf32>
    %32 = vector.shape_cast %31 : vector<8xf32> to vector<8x1xf32>
    %33 = arith.addf %30, %32 : vector<8x1xf32>
    %c0_14 = arith.constant 0 : index
    %c0_15 = arith.constant 0 : index
    %34 = vector.load %arg7[%c0_14, %c0_15] : memref<8x1xf32, #tpu.memory_space<vmem>>, vector<8x1xf32>
    tpu.vector_store %arg7[%c0_14, %c0_15], %33 {strides = array<i32>} : memref<8x1xf32, #tpu.memory_space<vmem>>, vector<8x1xf32>,
    %c0_16 = arith.constant 0 : index
    %c0_17 = arith.constant 0 : index
    %35 = vector.load %arg8[%c0_16, %c0_17] : memref<8x128xf32, #tpu.memory_space<vmem>>, vector<8x128xf32>
    %36 = vector.broadcast %25 : vector<8x1xf32> to vector<8x128xf32>
    %37 = arith.mulf %36, %35 : vector<8x128xf32>
    %38 = arith.truncf %28 : vector<8x8xf32> to vector<8x8xbf16>
    %cst_18 = arith.constant dense<0.000000e+00> : vector<8x128xf32>
    %39 = tpu.matmul %38, %6, %cst_18 {dimension_numbers = #tpu.dot_dimension_numbers<[1], [0], [0], [1], [0, 0, 1, 1], [], []>} : vector<8x8xbf16>, vector<8x128xbf16>, vector<8x128xf32> -> vector<8x128xf32>
    %40 = arith.addf %37, %39 : vector<8x128xf32>
    %c0_19 = arith.constant 0 : index
    %c0_20 = arith.constant 0 : index
    %41 = vector.load %arg8[%c0_19, %c0_20] : memref<8x128xf32, #tpu.memory_space<vmem>>, vector<8x128xf32>
    tpu.vector_store %arg8[%c0_19, %c0_20], %40 {strides = array<i32>} : memref<8x128xf32, #tpu.memory_space<vmem>>, vector<8x128xf32>,
    %c0_21 = arith.constant 0 : index
    %c0_22 = arith.constant 0 : index
    %42 = vector.load %arg6[%c0_21, %c0_22] : memref<8x1xf32, #tpu.memory_space<vmem>>, vector<8x1xf32>
    tpu.vector_store %arg6[%c0_21, %c0_22], %23 {strides = array<i32>} : memref<8x1xf32, #tpu.memory_space<vmem>>, vector<8x1xf32>,
    %c0_i32_23 = arith.constant 0 : i32
    %43 = arith.cmpi eq, %arg1, %c0_i32_23 : i32
    %44 = arith.extui %43 : i1 to i32
    %c0_i32_24 = arith.constant 0 : i32
    %45 = arith.cmpi ne, %44, %c0_i32_24 : i32
    scf.if %45 {
      %c0_25 = arith.constant 0 : index
      %c0_26 = arith.constant 0 : index
      %46 = vector.load %arg8[%c0_25, %c0_26] : memref<8x128xf32, #tpu.memory_space<vmem>>, vector<8x128xf32>
      %c0_27 = arith.constant 0 : index
      %c0_28 = arith.constant 0 : index
      %47 = vector.load %arg7[%c0_27, %c0_28] : memref<8x1xf32, #tpu.memory_space<vmem>>, vector<8x1xf32>
      %48 = tpu.reciprocal %47 {approx = true} : vector<8x1xf32> -> vector<8x1xf32>
      %49 = vector.broadcast %48 : vector<8x1xf32> to vector<8x128xf32>
      %50 = arith.mulf %46, %49 : vector<8x128xf32>
      %51 = arith.extf %4 : vector<8x128xbf16> to vector<8x128xf32>
      %52 = arith.addf %51, %50 : vector<8x128xf32>
      %53 = arith.truncf %52 : vector<8x128xf32> to vector<8x128xbf16>
      %c0_29 = arith.constant 0 : index
      %c0_30 = arith.constant 0 : index
      %c0_31 = arith.constant 0 : index
      %54 = vector.load %arg5[%c0_29, %c0_30, %c0_31] : memref<1x8x128xbf16, #tpu.memory_space<vmem>>, vector<1x8x128xbf16>
      %55 = vector.shape_cast %54 : vector<1x8x128xbf16> to vector<8x128xbf16>
      %56 = vector.shape_cast %53 : vector<8x128xbf16> to vector<1x8x128xbf16>
      tpu.vector_store %arg5[%c0_29, %c0_30, %c0_31], %56 {strides = array<i32>} : memref<1x8x128xbf16, #tpu.memory_space<vmem>>, vector<1x8x128xbf16>,
    } else {
    }
    return
  }
  func.func @transform_0(%arg0: i32, %arg1: i32, %arg2: memref<2xi32, #tpu.memory_space<smem>>) -> (i32, i32, i32) {
    %c0_i32 = arith.constant 0 : i32
    %c0_i32_0 = arith.constant 0 : i32
    %c0_i32_1 = arith.constant 0 : i32
    return %arg0, %c0_i32, %c0_i32_0 : i32, i32, i32
  }
  func.func @transform_1(%arg0: i32, %arg1: i32, %arg2: memref<2xi32, #tpu.memory_space<smem>>) -> (i32, i32, i32) {
    %c0_i32 = arith.constant 0 : i32
    %c0_i32_0 = arith.constant 0 : i32
    return %arg0, %arg1, %c0_i32 : i32, i32, i32
  }
  func.func @transform_2(%arg0: i32, %arg1: i32, %arg2: memref<2xi32, #tpu.memory_space<smem>>) -> (i32, i32, i32) {
    %c0_i32 = arith.constant 0 : i32
    %c0_i32_0 = arith.constant 0 : i32
    %c0_i32_1 = arith.constant 0 : i32
    return %arg0, %c0_i32, %c0_i32_0 : i32, i32, i32
  }
}

module attributes {stable_mosaic.version = 11 : i64} {
  func.func @_linear_bias_kernel(%arg0: i32, %arg1: i32, %arg2: memref<16x128xbf16, #tpu.memory_space<vmem>>, %arg3: memref<128x512xbf16, #tpu.memory_space<vmem>>, %arg4: memref<1x512xf32, #tpu.memory_space<vmem>>, %arg5: memref<16x512xf32, #tpu.memory_space<vmem>>) attributes {dimension_semantics = [#tpu.dimension_semantics<parallel>, #tpu.dimension_semantics<parallel>], iteration_bounds = array<i64: 1, 1>, scalar_prefetch = 0 : i64, scratch_operands = 0 : i64, tpu.core_type = #tpu.core_type<tc>, window_params = [{transform_indices = @transform_0, window_bounds = array<i64: 16, 128>}, {transform_indices = @transform_1, window_bounds = array<i64: 128, 512>}, {transform_indices = @transform_2, window_bounds = array<i64: 1, 512>}, {transform_indices = @transform_3, window_bounds = array<i64: 16, 512>}]} {
    %c0 = arith.constant 0 : index
    %c0_0 = arith.constant 0 : index
    %0 = vector.load %arg2[%c0, %c0_0] : memref<16x128xbf16, #tpu.memory_space<vmem>>, vector<16x128xbf16>
    %c0_1 = arith.constant 0 : index
    %c0_2 = arith.constant 0 : index
    %1 = vector.load %arg3[%c0_1, %c0_2] : memref<128x512xbf16, #tpu.memory_space<vmem>>, vector<128x512xbf16>
    %cst = arith.constant dense<0.000000e+00> : vector<16x512xf32>
    %2 = tpu.matmul %0, %1, %cst {dimension_numbers = #tpu.dot_dimension_numbers<[1], [0], [0], [1], [0, 0, 1, 1], [], []>} : vector<16x128xbf16>, vector<128x512xbf16>, vector<16x512xf32> -> vector<16x512xf32>
    %c0_3 = arith.constant 0 : index
    %c0_4 = arith.constant 0 : index
    %3 = vector.load %arg4[%c0_3, %c0_4] : memref<1x512xf32, #tpu.memory_space<vmem>>, vector<1x512xf32>
    %4 = vector.broadcast %3 : vector<1x512xf32> to vector<16x512xf32>
    %5 = arith.addf %2, %4 : vector<16x512xf32>
    %c0_5 = arith.constant 0 : index
    %c0_6 = arith.constant 0 : index
    %6 = vector.load %arg5[%c0_5, %c0_6] : memref<16x512xf32, #tpu.memory_space<vmem>>, vector<16x512xf32>
    tpu.vector_store %arg5[%c0_5, %c0_6], %5 {strides = array<i32>} : memref<16x512xf32, #tpu.memory_space<vmem>>, vector<16x512xf32>,
    return
  }
  func.func @transform_0(%arg0: i32, %arg1: i32) -> (i32, i32) {
    %c0_i32 = arith.constant 0 : i32
    %c0_i32_0 = arith.constant 0 : i32
    return %arg0, %c0_i32 : i32, i32
  }
  func.func @transform_1(%arg0: i32, %arg1: i32) -> (i32, i32) {
    %c0_i32 = arith.constant 0 : i32
    %c0_i32_0 = arith.constant 0 : i32
    return %c0_i32, %arg1 : i32, i32
  }
  func.func @transform_2(%arg0: i32, %arg1: i32) -> (i32, i32) {
    %c0_i32 = arith.constant 0 : i32
    %c0_i32_0 = arith.constant 0 : i32
    return %c0_i32, %arg1 : i32, i32
  }
  func.func @transform_3(%arg0: i32, %arg1: i32) -> (i32, i32) {
    %c0_i32 = arith.constant 0 : i32
    return %arg0, %arg1 : i32, i32
  }
}

module attributes {stable_mosaic.version = 11 : i64} {
  func.func @_enc_linear_relu_kernel(%arg0: i32, %arg1: i32, %arg2: memref<2xi32, #tpu.memory_space<smem>>, %arg3: memref<1x8x128xbf16, #tpu.memory_space<vmem>>, %arg4: memref<128x128xbf16, #tpu.memory_space<vmem>>, %arg5: memref<1x128xf32, #tpu.memory_space<vmem>>, %arg6: memref<1x8x128xbf16, #tpu.memory_space<vmem>>) attributes {dimension_semantics = [#tpu.dimension_semantics<parallel>, #tpu.dimension_semantics<parallel>], iteration_bounds = array<i64: 2, 1>, scalar_prefetch = 1 : i64, scratch_operands = 0 : i64, tpu.core_type = #tpu.core_type<tc>, window_params = [{transform_indices = @transform_0, window_bounds = array<i64: 1, 8, 128>}, {transform_indices = @transform_1, window_bounds = array<i64: 128, 128>}, {transform_indices = @transform_2, window_bounds = array<i64: 1, 128>}, {transform_indices = @transform_3, window_bounds = array<i64: 1, 8, 128>}]} {
    %c0 = arith.constant 0 : index
    %c0_0 = arith.constant 0 : index
    %c0_1 = arith.constant 0 : index
    %0 = vector.load %arg3[%c0, %c0_0, %c0_1] : memref<1x8x128xbf16, #tpu.memory_space<vmem>>, vector<1x8x128xbf16>
    %1 = vector.shape_cast %0 : vector<1x8x128xbf16> to vector<8x128xbf16>
    %c0_2 = arith.constant 0 : index
    %c0_3 = arith.constant 0 : index
    %2 = vector.load %arg4[%c0_2, %c0_3] : memref<128x128xbf16, #tpu.memory_space<vmem>>, vector<128x128xbf16>
    %cst = arith.constant dense<0.000000e+00> : vector<8x128xf32>
    %3 = tpu.matmul %1, %2, %cst {dimension_numbers = #tpu.dot_dimension_numbers<[1], [0], [0], [1], [0, 0, 1, 1], [], []>} : vector<8x128xbf16>, vector<128x128xbf16>, vector<8x128xf32> -> vector<8x128xf32>
    %c0_4 = arith.constant 0 : index
    %c0_5 = arith.constant 0 : index
    %4 = vector.load %arg5[%c0_4, %c0_5] : memref<1x128xf32, #tpu.memory_space<vmem>>, vector<1x128xf32>
    %5 = vector.broadcast %4 : vector<1x128xf32> to vector<8x128xf32>
    %6 = arith.addf %3, %5 : vector<8x128xf32>
    %cst_6 = arith.constant 0.000000e+00 : f32
    %7 = vector.broadcast %cst_6 : f32 to vector<8x128xf32>
    %8 = arith.maximumf %6, %7 : vector<8x128xf32>
    %9 = tpu.iota {dimensions = array<i32: 0>} : vector<8x128xi32>
    %10 = arith.index_cast %arg0 : i32 to index
    %11 = memref.load %arg2[%10] : memref<2xi32, #tpu.memory_space<smem>>
    %12 = vector.broadcast %11 : i32 to vector<8x128xi32>
    %13 = arith.cmpi slt, %9, %12 : vector<8x128xi32>
    %cst_7 = arith.constant 0.000000e+00 : f32
    %14 = vector.broadcast %cst_7 : f32 to vector<8x128xf32>
    %15 = arith.select %13, %8, %14 : vector<8x128xi1>, vector<8x128xf32>
    %16 = arith.truncf %15 : vector<8x128xf32> to vector<8x128xbf16>
    %c0_8 = arith.constant 0 : index
    %c0_9 = arith.constant 0 : index
    %c0_10 = arith.constant 0 : index
    %17 = vector.load %arg6[%c0_8, %c0_9, %c0_10] : memref<1x8x128xbf16, #tpu.memory_space<vmem>>, vector<1x8x128xbf16>
    %18 = vector.shape_cast %17 : vector<1x8x128xbf16> to vector<8x128xbf16>
    %19 = vector.shape_cast %16 : vector<8x128xbf16> to vector<1x8x128xbf16>
    tpu.vector_store %arg6[%c0_8, %c0_9, %c0_10], %19 {strides = array<i32>} : memref<1x8x128xbf16, #tpu.memory_space<vmem>>, vector<1x8x128xbf16>,
    return
  }
  func.func @transform_0(%arg0: i32, %arg1: i32, %arg2: memref<2xi32, #tpu.memory_space<smem>>) -> (i32, i32, i32) {
    %c0_i32 = arith.constant 0 : i32
    %c0_i32_0 = arith.constant 0 : i32
    %c0_i32_1 = arith.constant 0 : i32
    return %arg0, %c0_i32, %c0_i32_0 : i32, i32, i32
  }
  func.func @transform_1(%arg0: i32, %arg1: i32, %arg2: memref<2xi32, #tpu.memory_space<smem>>) -> (i32, i32) {
    %c0_i32 = arith.constant 0 : i32
    %c0_i32_0 = arith.constant 0 : i32
    return %c0_i32, %arg1 : i32, i32
  }
  func.func @transform_2(%arg0: i32, %arg1: i32, %arg2: memref<2xi32, #tpu.memory_space<smem>>) -> (i32, i32) {
    %c0_i32 = arith.constant 0 : i32
    %c0_i32_0 = arith.constant 0 : i32
    return %c0_i32, %arg1 : i32, i32
  }
  func.func @transform_3(%arg0: i32, %arg1: i32, %arg2: memref<2xi32, #tpu.memory_space<smem>>) -> (i32, i32, i32) {
    %c0_i32 = arith.constant 0 : i32
    %c0_i32_0 = arith.constant 0 : i32
    return %arg0, %c0_i32, %arg1 : i32, i32, i32
  }
}

</mosaic_0001>

<bundles_post_ra>
// kernel: fairseq_encoder_decoder_forward.3
= control target key start
LH: loop header
LB: loop body
LE: loop exit
PB: predicated region body
PF: predicated region fallthrough
CT: control target
= control target key end

     0   :  { %s1127_s0 = inlined_call_operand.hbm [shape: s32[2], index: 0, kind: input, shape index: {}]   ;;  %s1128_s1 = inlined_call_operand.hbm [shape: bf16[2,8,128], index: 1, kind: input, shape index: {}]   ;;  %s1129_s2 = inlined_call_operand.hbm [shape: bf16[128,128], index: 2, kind: input, shape index: {}]   ;;  %s1130_s3 = inlined_call_operand.hbm [shape: f32[1,128], index: 3, kind: input, shape index: {}]   ;;  %s1131_s4 = inlined_call_operand.hbm [shape: bf16[2,8,128], index: 4, kind: output, shape index: {}]  }
   0x1   :  { %s636_s17 = scalar_lea.hbm %s1127_s0, 16 }
   0x2   :  { %p637_p0 = scmp.ne.s32.totalorder %s1127_s0, %s636_s17  ;;  %p640_p1 = scmp.lt.u32.totalorder %s636_s17, %s1127_s0 }
   0x4   :  { %p642_p2 = pnand %p640_p1, %p637_p0 }
   0x6   :  { %645 = shalt.err (!%p642_p2)  }
   0x7   :  { %s822_s22 = smov [#allocation3]  }
   0x8   :  { %10 = dma.hbm_to_smem %s1127_s0, 16, %s822_s22, [#allocation2] }
   0x9   :  { %784 = dma.done.wait [#allocation2], 16 }
   0xa   :  { %785 = vsyncadd [#allocation2], 4294967280 }
   0xb   :  { %12 = sfence }
   0xc   :  { %13 = vsyncpa [#allocation5], 0 }
   0xd   :  { %15 = vsyncpa [#allocation5 + $0x1], 0 }
   0xe   :  { %16 = vsyncpa [#allocation8], 0 }
   0xf   :  { %17 = vsyncpa [#allocation6], 0 }
  0x10   :  { %19 = vsyncpa [#allocation6 + $0x1], 0  ;;  %s868_s25 = smov 0   ;;  %s870_s26 = smov 0  }
  0x11   :  { %s872_s27 = smov 0   ;;  %s874_s28 = smov 0  }
  0x12   :  { %s876_s29 = smov 0   ;;  %s878_s30 = smov 0  }
  0x13 LB: > { %s485_s0 = sadd.s32 4294967295, %s820_s30   ;;  %s486_s5 = sadd.s32 4294967294, %s820_s30   ;;  %s820_s30 = sphi %s878_s30, %s25_s30   ;;  %s816_s29 = sphi %s876_s29, %s1153_s29   ;;  %s812_s28 = sphi %s874_s28, %s1152_s28   ;;  %s808_s27 = sphi %s872_s27, %s1151_s27   ;;  %s804_s26 = sphi %s870_s26, %s1150_s26   ;;  %s800_s25 = sphi %s868_s25, %s1149_s25  }
  0x14   : > { %p57_p3 = scmp.ne.s32.totalorder %s804_s26, %s800_s25  ;;  %p902_p4 = scmp.eq.s32.totalorder %s485_s0, 0 }
  0x15   : > { %p906_p5 = scmp.eq.s32.totalorder %s485_s0, 1  ;;  %p141_p6 = scmp.eq.s32.totalorder %s486_s5, 1 }
  0x16   : > { %s1136_s6 = scalar_select %p902_p4, 1, 0 }
  0x17   : > { %p912_p7 = por %p902_p4, %p57_p3  ;;  %p487_p8 = scmp.ge.s32.totalorder %s820_s30, 1 }
  0x18   : > { %p917_p9 = por %p141_p6, %p57_p3  ;;  %p148_p10 = scmp.lt.s32.totalorder %s820_s30, 3 }
  0x19   : > { %s1138_s8 = scalar_select %p912_p7, 1, 0 }
  0x1a   : > { %s1139_s9 = scalar_select %p917_p9, 1, 0 }
  0x1b   : > { %p922_p11 = pnand %p487_p8, %p148_p10  ;;  %s823_s11 = smov [#allocation7]  }
  0x1c   : > { %s162_s12 = sshll.u32 %s823_s11, 4  ;;  %s824_s14 = smov [#allocation9]   ;;  %s926_s12 = int_to_ptr.vmem [resolvable:$true] %s162_s12 }
  0x1d   : > { %p552_p12 = pneg %p922_p11  ;;  %s178_s15 = sshll.u32 %s824_s14, 4  ;;  %s937_s15 = int_to_ptr.vmem [resolvable:$true] %s178_s15 }
  0x1e   : > { %s646_s18 = scalar_lea.hbm %s1129_s2, 1024 }
  0x1f   : > { %p933_p0 = pnand %p552_p12, %p902_p4  ;;  %p647_p1 = scmp.ne.s32.totalorder %s1129_s2, %s646_s18 }
  0x20   : > { %p653_p8 = scmp.lt.u32.totalorder %s646_s18, %s1129_s2 }
  0x21   : > { %p648_p2 = pneg %p933_p0 }
  0x23   : > { %p649_p3 = pnand %p648_p2, %p647_p1 }
  0x25   : > { %p650_p6 = pneg %p649_p3 }
  0x27   : > { %p655_p10 = pnand %p653_p8, %p650_p6 }
  0x29   : > { %658 = shalt.err (!%p655_p10)
}
  0x2a   : > { %s659_s23 = scalar_lea.vmem %s926_s12, 1024  ;;  %p667_p4 = scmp.lt.s32.totalorder %s926_s12, %s926_s12 }
  0x2b   : > { %p660_p12 = scmp.ne.s32.totalorder %s926_s12, %s659_s23  ;;  %p668_p1 = scmp.lt.s32.totalorder %s659_s23, %s659_s23 }
  0x2d   : > { %p662_p13 = pnand %p660_p12, %p648_p2  ;;  %p669_p3 = por %p668_p1, %p667_p4 }
  0x2f   : > { %p663_p9 = pneg %p662_p13 }
  0x31   : > { %p670_p7 = pnand %p669_p3, %p663_p9 }
  0x33   : > { %673 = shalt.err (!%p670_p7)
}
  0x34   : > { %s825_s24 = smov 64   ;;  %s826_s0 = smov 4  }
  0x35   : > { %555 = dma.hbm_to_vmem [thread:$0]  (!%p933_p0), %s1129_s2, 1024, %s926_s12, [#allocation8], %s825_s24, %s825_s24, %s826_s0  }
  0x36   : > { %s674_s17 = scalar_lea.hbm %s1130_s3, 16 }
  0x37   : > { %p675_p4 = scmp.ne.s32.totalorder %s1130_s3, %s674_s17  ;;  %p681_p13 = scmp.lt.u32.totalorder %s674_s17, %s1130_s3 }
  0x39   : > { %p677_p7 = pnand %p675_p4, %p648_p2 }
  0x3b   : > { %p678_p9 = pneg %p677_p7 }
  0x3d   : > { %p683_p6 = pnand %p681_p13, %p678_p9 }
  0x3f   : > { %686 = shalt.err (!%p683_p6)
}
  0x40   : > { %s687_s12 = scalar_lea.vmem %s937_s15, 16  ;;  %s694_s22 = scalar_lea.vmem %s937_s15, 32 }
  0x41   : > { %p688_p8 = scmp.ne.s32.totalorder %s937_s15, %s687_s12  ;;  %p695_p1 = scmp.lt.s32.totalorder %s937_s15, %s937_s15 }
  0x42   : > { %p696_p3 = scmp.lt.s32.totalorder %s694_s22, %s687_s12 }
  0x43   : > { %p690_p10 = pnand %p688_p8, %p648_p2 }
  0x44   : > { %p697_p4 = por %p696_p3, %p695_p1 }
  0x45   : > { %p691_p12 = pneg %p690_p10 }
  0x47   : > { %p698_p7 = pnand %p697_p4, %p691_p12 }
  0x49   : > { %701 = shalt.err (!%p698_p7)
}
  0x4a   : > { %558 = dma.hbm_to_vmem [thread:$0]  (!%p933_p0), %s1130_s3, 16, %s937_s15, [#allocation8]  }
  0x4b   : > { %s37_s0 = sadd.s32 1, %s816_s29  ;;  %s44_s5 = sadd.s32 1, %s808_s27 }
  0x4c   : > { %p39_p2 = scmp.ge.s32.totalorder %s37_s0, 2  ;;  %p51_p9 = scmp.ne.s32.totalorder %s808_s27, %s804_s26 }
  0x4d   : > { %p52_p13 = scmp.eq.s32.totalorder %s820_s30, 0  ;;  %p569_p6 = scmp.lt.s32.totalorder %s820_s30, 2 }
  0x4e   : > { %s1155_s0 = smov (%p39_p2, %s37_s0), 0  ;;  %p1002_p10 = por %p906_p5, %p51_p9 }
  0x4f   : > { %p53_p8 = por %p52_p13, %p51_p9  ;;  %s41_s11 = ssub.s32 %s816_s29, %s1155_s0 }
  0x50   : > { %s1142_s13 = scalar_select %p1002_p10, 1, 0 }
  0x51   : > { %s189_s14 = sand.u32 1, %s808_s27   ;;  %p42_p12 = scmp.eq.s32.totalorder %s41_s11, 0 }
  0x52   : > { %s491_s15 = sshll.u32 %s189_s14, 2  ;;  %s492_s16 = sshll.u32 %s816_s29, 6 }
  0x53   : > { %s1011_s17 = scalar_select %p42_p12, %s808_s27, %s44_s5  }
  0x54   : > { %s1016_s20 = scalar_lea.hbm %s1128_s1, %s492_s16  ;;  %s193_s7 = scalar_lea.vmem [#allocation4], %s491_s15 }
  0x55   : > { %s200_s21 = sshll.u32 %s193_s7, 4  ;;  %p1020_p5 = pnand %p569_p6, %p53_p8  ;;  %s1024_s21 = int_to_ptr.vmem [resolvable:$true] %s200_s21 }
  0x56   : > { %s190_s22 = scalar_lea.sflag [#allocation5], %s189_s14  ;;  %s702_s23 = scalar_lea.hbm %s1016_s20, 64 }
  0x57   : > { %p703_p0 = scmp.ne.s32.totalorder %s1016_s20, %s702_s23  ;;  %p704_p1 = pneg %p1020_p5 }
  0x58   : > { %s707_s11 = scalar_lea.hbm %s1128_s1, 128  ;;  %p708_p7 = scmp.lt.u32.totalorder %s1016_s20, %s1128_s1 }
  0x59   : > { %p705_p3 = pnand %p704_p1, %p703_p0  ;;  %p709_p2 = scmp.lt.u32.totalorder %s707_s11, %s702_s23 }
  0x5a   : > { %p711_p13 = scmp.lt.u32.totalorder %s702_s23, %s1016_s20 }
  0x5b   : > { %p706_p4 = pneg %p705_p3  ;;  %p710_p9 = por %p709_p2, %p708_p7 }
  0x5d   : > { %p712_p6 = por %p711_p13, %p710_p9 }
  0x5f   : > { %p713_p8 = pnand %p712_p6, %p706_p4 }
  0x61   : > { %716 = shalt.err (!%p713_p8)
}
  0x62   : > { %s717_s14 = scalar_lea.vmem %s1024_s21, 64  ;;  %s827_s18 = smov [#allocation4]  }
  0x63   : > { %p718_p12 = scmp.ne.s32.totalorder %s1024_s21, %s717_s14  ;;  %s722_s19 = sshll.u32 %s827_s18, 4  ;;  %s723_s19 = int_to_ptr.vmem [resolvable:$false] %s722_s19 }
  0x64   : > { %s724_s7 = scalar_lea.vmem %s723_s19, 128  ;;  %p725_p10 = scmp.lt.s32.totalorder %s1024_s21, %s723_s19 }
  0x65   : > { %p720_p0 = pnand %p718_p12, %p704_p1  ;;  %p726_p7 = scmp.lt.s32.totalorder %s724_s7, %s717_s14 }
  0x67   : > { %p721_p3 = pneg %p720_p0  ;;  %p727_p2 = por %p726_p7, %p725_p10 }
  0x69   : > { %p728_p9 = pnand %p727_p2, %p721_p3 }
  0x6b   : > { %731 = shalt.err (!%p728_p9)
}
  0x6c   : > { %562 = dma.hbm_to_vmem [thread:$0]  (!%p1020_p5), %s1016_s20, 64, %s1024_s21, %s190_s22  }
  0x6d   : > { %209 = sbr.rel (%p922_p11) target bundleno = 386 (0x182), region = 32  ;;  %s1054_s23 = sand.u32 (!%p922_p11), 1, %s804_s26  }
  0x6e   : > { %s494_s24 = sshll.u32 (!%p922_p11), %s1054_s23, 2  ;;  %s212_s5 = scalar_lea.sflag (!%p922_p11), [#allocation5], %s1054_s23 }
  0x6f   : > { %s1060_s11 = scalar_lea.vmem (!%p922_p11), [#allocation4], %s494_s24  ;;  %p1144_p10 = scmp.ne.s32.totalorder (!%p922_p11), %s1138_s8, 0 }
  0x74   : > { %787 = dma.done.wait (%p1144_p10), %s212_s5, 64  }
  0x75   : > { %789 = vsyncadd (%p1144_p10), %s212_s5, 4294967232  ;;  %p1145_p5 = scmp.ne.s32.totalorder %s1136_s6, 0 }
  0x77   : > { %791 = dma.done.wait (%p1145_p5), [#allocation8], 1040  }
  0x78   : > { %793 = vsyncadd (%p1145_p5), [#allocation8], 4294966256  ;;  %v828_v0 = vmov 0.0   ;;  %vm829_vm0 = vmmov 0   ;;  %v628_v1 = vld [vmem:[#allocation7] sm:$0xff]   ;;  %v629_v2 = vld [vmem:[#allocation7 + $0x8] sm:$0xff]   ;;  %v360_v10 = vlaneseq }
  0x79   : > { %520 = vmatprep.subr.bf16.mxu0 %v828_v0  ;;  %536 = vmatprep.mubr.msk.bf16.mxu0 %vm829_vm0, %v828_v0  ;;  %v630_v3 = vld [vmem:[#allocation7 + $0x10] sm:$0xff]   ;;  %v631_v4 = vld [vmem:[#allocation7 + $0x18] sm:$0xff]   ;;  %v632_v5 = vld [vmem:[#allocation7 + $0x20] sm:$0xff]   ;;  %s362_s6 = sld [smem:[#allocation3 + %s812_s28]]  ;;  %s508_s8 = sshll.u32 %s812_s28, 6 }
  0x7a   : > { %521 = vmatpush3.bf16.msra.mxu0 %v628_v1  ;;  %v633_v6 = vld [vmem:[#allocation7 + $0x28] sm:$0xff]   ;;  %v634_v7 = vld [vmem:[#allocation7 + $0x30] sm:$0xff]   ;;  %v635_v8 = vld [vmem:[#allocation7 + $0x38] sm:$0xff]   ;;  %v361_v12 = vshrl.u32 %v360_v10, 7  ;;  %s245_s10 = scalar_lea.vmem [#allocation10], %s494_s24  ;;  %s1078_s22 = scalar_lea.hbm %s1131_s4, %s508_s8 }
  0x7b   : > { %522 = vmatprep.subr.bf16.mxu0 %v828_v0  ;;  %v247_v9 = vld [vmem:[%s1060_s11] sm:$0xf]  ;;  %v498_v11 = vld [vmem:[#allocation9] ss:$0 sm:$0xff]  ;;  %s383_s20 = sshll.u32 %s245_s10, 4  ;;  %s369_s15 = scalar_lea.sflag [#allocation6], %s1054_s23  ;;  %s1080_s20 = int_to_ptr.vmem [resolvable:$true] %s383_s20 }
  0x7c   : > { %s732_s16 = scalar_lea.vmem %s1080_s20, 64  ;;  %p1146_p1 = scmp.ne.s32.totalorder %s1142_s13, 0 }
  0x7d   : > { %p733_p11 = scmp.ne.s32.totalorder %s1080_s20, %s732_s16  ;;  %s830_s28 = smov [#allocation10]  }
  0x7e   : > { %523 = vmatpush3.bf16.msra.mxu0 %v629_v2  ;;  %s736_s14 = sshll.u32 %s830_s28, 4  ;;  %s737_s14 = int_to_ptr.vmem [resolvable:$false] %s736_s14 }
  0x7f   : > { %524 = vmatprep.subr.bf16.mxu0 %v828_v0  ;;  %v363_v13 = vstv %s362_s6  ;;  %p734_p4 = pnand %p733_p11, %p1146_p1  ;;  %s738_s18 = scalar_lea.vmem %s737_s14, 128 }
  0x80   : > { %vm364_vm1 = vcmp.lt.s32.totalorder %v361_v12, %v363_v13  ;;  %p739_p6 = scmp.lt.s32.totalorder %s1080_s20, %s737_s14  ;;  %p740_p8 = scmp.lt.s32.totalorder %s738_s18, %s732_s16 }
  0x81   : > { %p735_p13 = pneg %p734_p4 }
  0x82   : > { %525 = vmatpush3.bf16.msra.mxu0 %v630_v3  ;;  %p741_p12 = por %p740_p8, %p739_p6 }
  0x83   : > { %526 = vmatprep.subr.bf16.mxu0 %v828_v0 }
  0x84   : > { %p742_p0 = pnand %p741_p12, %p735_p13 }
  0x86   : > { %527 = vmatpush3.bf16.msra.mxu0 %v631_v4 }
  0x87   : > { %528 = vmatprep.subr.bf16.mxu0 %v828_v0 }
  0x8a   : > { %529 = vmatpush3.bf16.msra.mxu0 %v632_v5 }
  0x8b   : > { %530 = vmatprep.subr.bf16.mxu0 %v828_v0 }
  0x8e   : > { %531 = vmatpush3.bf16.msra.mxu0 %v633_v6 }
  0x8f   : > { %532 = vmatprep.subr.bf16.mxu0 %v828_v0 }
  0x92   : > { %533 = vmatpush3.bf16.msra.mxu0 %v634_v7 }
  0x93   : > { %534 = vmatprep.subr.bf16.mxu0 %v828_v0 }
  0x96   : > { %535 = vmatpush3.bf16.msra.mxu0 %v635_v8 }
  0x99   : > { %537 = vmatmul.mubr.bf16.vlgmr.msra.gmra.mrb[0].mxu0 %v247_v9 }
 0x16c   : > { %v353_v14 = vpop.f32.mrb[0].mxu0 }
 0x16d   : > { %v354_v15 = vadd.f32 %v498_v11, %v353_v14  ;;  %v538_v16 = vpop.f32.mrb[1].mxu0 }
 0x16e   : > { %v356_v17 = vpop.f32.mrb[2].mxu0 }
 0x16f   : > { %v359_v18 = vmax.f32 %v354_v15, 0.0  ;;  %v539_v19 = vpop.f32.mrb[3].mxu0 }
 0x171   : > { %v365_v20 = vsel %vm364_vm1, %v359_v18, 0.0 }
 0x172   : > { %v366_v21 = vpack.c.bf16 %v365_v20, %v365_v20 }
 0x174   : > { %367 = vst [vmem:[%s245_s10] sm:$0xf] %v366_v21 }
 0x175   : > { %745 = shalt.err (!%p742_p0)
}
 0x176   : > { %s746_s19 = scalar_lea.hbm %s1078_s22, 64  ;;  %s750_s24 = scalar_lea.hbm %s1131_s4, 128 }
 0x177   : > { %p747_p3 = scmp.ne.s32.totalorder %s1078_s22, %s746_s19  ;;  %p751_p9 = scmp.lt.u32.totalorder %s1078_s22, %s1131_s4 }
 0x178   : > { %p752_p10 = scmp.lt.u32.totalorder %s750_s24, %s746_s19  ;;  %p754_p11 = scmp.lt.u32.totalorder %s746_s19, %s1078_s22 }
 0x179   : > { %p748_p7 = pnand %p747_p3, %p1146_p1 }
 0x17a   : > { %p753_p5 = por %p752_p10, %p751_p9 }
 0x17b   : > { %p749_p2 = pneg %p748_p7 }
 0x17c   : > { %p755_p4 = por %p754_p11, %p753_p5 }
 0x17e   : > { %p756_p13 = pnand %p755_p4, %p749_p2 }
 0x180   : > { %759 = shalt.err (!%p756_p13)
}
 0x181   : > { %550 = dma.vmem_to_hbm [thread:$0]  (%p1146_p1), %s1080_s20, 64, %s1078_s22, %s369_s15  }
 0x182 PF: > { %s395_s6 = sand.u32 1, %s800_s25   ;;  %p1147_p6 = scmp.ne.s32.totalorder %s1139_s9, 0 }
 0x183   : > { %p1148_p8 = scmp.ge.s32.totalorder %s820_s30, 2  ;;  %s396_s8 = scalar_lea.sflag [#allocation6], %s395_s6 }
 0x185   : > { %p564_p12 = pnand %p1148_p8, %p1147_p6 }
 0x187   : > { %795 = dma.done.wait (!%p564_p12), %s396_s8, 64  }
 0x188   : > { %797 = vsyncadd (!%p564_p12), %s396_s8, 4294967232  ;;  %s25_s30 = sadd.s32 1, %s820_s30   ;;  %s1149_s25 = smov %s804_s26 }
 0x189   : > { %p22_p0 = scmp.ge.s32.totalorder %s25_s30, 4   ;;  %s1150_s26 = smov %s808_s27 }
 0x18a   : > { %s1151_s27 = smov %s1011_s17  ;;  %s1152_s28 = smov %s816_s29 }
 0x18b   : > { %s1153_s29 = smov %s1155_s0  ;;  %24 = sbr.rel (!%p22_p0) target bundleno = 19 (0x13), region = 87 }
 0x192   :  { %401 = vsyncpa [#allocation5], 1 }
 0x193   :  { %403 = vsyncpa [#allocation5 + $0x1], 1 }
 0x194   :  { %404 = vsyncpa [#allocation8], 1 }
 0x195   :  { %405 = vsyncpa [#allocation6], 1 }
 0x196   :  { %407 = vsyncpa [#allocation6 + $0x1], 1 }

// kernel: fairseq_encoder_decoder_forward.5
= control target key start
LH: loop header
LB: loop body
LE: loop exit
PB: predicated region body
PF: predicated region fallthrough
CT: control target
= control target key end

     0   :  { %8 = vsyncpa [#allocation3], 0  ;;  %s655_s0 = inlined_call_operand.hbm [shape: bf16[16,128], index: 0, kind: input, shape index: {}]   ;;  %s656_s1 = inlined_call_operand.hbm [shape: bf16[128,512], index: 1, kind: input, shape index: {}]   ;;  %s657_s2 = inlined_call_operand.hbm [shape: f32[1,512], index: 2, kind: input, shape index: {}]   ;;  %s658_s3 = inlined_call_operand.hbm [shape: f32[16,512], index: 3, kind: output, shape index: {}]  }
   0x1   :  { %9 = vsyncpa [#allocation6], 0 }
   0x2   :  { %10 = vsyncpa [#allocation4], 0  ;;  %s576_s12 = smov [#allocation5]   ;;  %s482_s16 = scalar_lea.hbm %s656_s1, 4096 }
   0x3   :  { %s28_s13 = sshll.u32 %s576_s12, 4  ;;  %p483_p0 = scmp.ne.s32.totalorder %s656_s1, %s482_s16  ;;  %s29_s13 = int_to_ptr.vmem [resolvable:$true] %s28_s13 }
   0x4   :  { %p486_p1 = scmp.lt.u32.totalorder %s482_s16, %s656_s1 }
   0x6   :  { %p488_p2 = pnand %p486_p1, %p483_p0 }
   0x8   :  { %491 = shalt.err (!%p488_p2)
}
   0x9   :  { %s492_s21 = scalar_lea.vmem %s29_s13, 4096  ;;  %p497_p4 = scmp.lt.s32.totalorder %s29_s13, %s29_s13 }
   0xa   :  { %p493_p3 = scmp.ne.s32.totalorder %s29_s13, %s492_s21  ;;  %p498_p5 = scmp.lt.s32.totalorder %s492_s21, %s492_s21 }
   0xc   :  { %p499_p6 = por %p498_p5, %p497_p4 }
   0xe   :  { %p500_p7 = pnand %p499_p6, %p493_p3 }
  0x10   :  { %503 = shalt.err (!%p500_p7)
}
  0x11   :  { %s577_s22 = smov 256   ;;  %s578_s23 = smov 16  }
  0x12   :  { %34 = dma.hbm_to_vmem [thread:$0]  %s656_s1, 4096, %s29_s13, [#allocation6], %s577_s22, %s577_s22, %s578_s23  }
  0x13   :  { %s579_s26 = smov [#allocation2]   ;;  %s504_s30 = scalar_lea.hbm %s655_s0, 128 }
  0x14   :  { %s16_s27 = sshll.u32 %s579_s26, 4  ;;  %p505_p8 = scmp.ne.s32.totalorder %s655_s0, %s504_s30  ;;  %s17_s27 = int_to_ptr.vmem [resolvable:$true] %s16_s27 }
  0x15   :  { %p508_p9 = scmp.lt.u32.totalorder %s504_s30, %s655_s0 }
  0x17   :  { %p510_p10 = pnand %p508_p9, %p505_p8 }
  0x19   :  { %513 = shalt.err (!%p510_p10)
}
  0x1a   :  { %s514_s8 = scalar_lea.vmem %s17_s27, 128  ;;  %p519_p12 = scmp.lt.s32.totalorder %s17_s27, %s17_s27 }
  0x1b   :  { %p515_p11 = scmp.ne.s32.totalorder %s17_s27, %s514_s8  ;;  %p520_p13 = scmp.lt.s32.totalorder %s514_s8, %s514_s8 }
  0x1d   :  { %p521_p0 = por %p520_p13, %p519_p12 }
  0x1f   :  { %p522_p1 = pnand %p521_p0, %p515_p11 }
  0x21   :  { %525 = shalt.err (!%p522_p1)
}
  0x22   :  { %s580_s1 = smov 64   ;;  %s581_s9 = smov 4  }
  0x23   :  { %22 = dma.hbm_to_vmem [thread:$0]  %s655_s0, 128, %s17_s27, [#allocation3], %s580_s1, %s580_s1, %s581_s9  }
  0x24   :  { %s582_s12 = smov [#allocation7]   ;;  %s526_s16 = scalar_lea.hbm %s657_s2, 64 }
  0x25   :  { %s41_s13 = sshll.u32 %s582_s12, 4  ;;  %p527_p2 = scmp.ne.s32.totalorder %s657_s2, %s526_s16  ;;  %s42_s13 = int_to_ptr.vmem [resolvable:$true] %s41_s13 }
  0x26   :  { %p530_p3 = scmp.lt.u32.totalorder %s526_s16, %s657_s2 }
  0x28   :  { %p532_p4 = pnand %p530_p3, %p527_p2 }
  0x2a   :  { %535 = shalt.err (!%p532_p4)
}
  0x2b   :  { %s536_s21 = scalar_lea.vmem %s42_s13, 64  ;;  %p541_p6 = scmp.lt.s32.totalorder %s42_s13, %s42_s13 }
  0x2c   :  { %p537_p5 = scmp.ne.s32.totalorder %s42_s13, %s536_s21  ;;  %p542_p7 = scmp.lt.s32.totalorder %s536_s21, %s536_s21 }
  0x2e   :  { %p543_p8 = por %p542_p7, %p541_p6 }
  0x30   :  { %p544_p9 = pnand %p543_p8, %p537_p5 }
  0x32   :  { %547 = shalt.err (!%p544_p9)
}
  0x33   :  { %44 = dma.hbm_to_vmem [thread:$0]  %s657_s2, 64, %s42_s13, [#allocation6]  }
  0x34   :  { %570 = dma.done.wait [#allocation3], 128  }
  0x35   :  { %571 = vsyncadd [#allocation3], 4294967168 }
  0x36   :  { %572 = dma.done.wait [#allocation6], 4160  }
  0x37   :  { %573 = vsyncadd [#allocation6], 4294963136  ;;  %v583_v0 = vmov 0   ;;  %v433_v1 = vld [vmem:[#allocation5 + $0x4] ss:$16 sps:$4 sm:$0xff]   ;;  %v481_v33 = vld [vmem:[#allocation2] sm:$0xff]   ;;  %v91_v34 = vlaneseq }
  0x38   :  { %309 = vmatprep.mubr.bf16.mxu0 %v583_v0  ;;  %352 = vmatprep.mubr.bf16.mxu1 %v583_v0  ;;  %v435_v2 = vld [vmem:[#allocation5 + $0xc] ss:$16 sps:$4 sm:$0xff]   ;;  %v437_v3 = vld [vmem:[#allocation5] ss:$16 sps:$4 sm:$0xff]   ;;  %v438_v4 = vld [vmem:[#allocation5 + $0x8] ss:$16 sps:$4 sm:$0xff]  }
  0x39   :  { %277 = vmatprep.subr.bf16.mxu0 %v433_v1  ;;  %320 = vmatprep.subr.bf16.mxu1 %v435_v2  ;;  %v439_v5 = vld [vmem:[#allocation5 + $0x24] ss:$16 sps:$4 sm:$0xff]   ;;  %v441_v6 = vld [vmem:[#allocation5 + $0x2c] ss:$16 sps:$4 sm:$0xff]   ;;  %v443_v7 = vld [vmem:[#allocation5 + $0x20] ss:$16 sps:$4 sm:$0xff]  }
  0x3a   :  { %278 = vmatpush1.bf16.msra.mxu0 %v437_v3  ;;  %321 = vmatpush1.bf16.msra.mxu1 %v438_v4  ;;  %v444_v8 = vld [vmem:[#allocation5 + $0x28] ss:$16 sps:$4 sm:$0xff]   ;;  %v445_v9 = vld [vmem:[#allocation5 + $0x44] ss:$16 sps:$4 sm:$0xff]   ;;  %v447_v10 = vld [vmem:[#allocation5 + $0x4c] ss:$16 sps:$4 sm:$0xff]  }
  0x3b   :  { %279 = vmatprep.subr.bf16.mxu0 %v439_v5  ;;  %322 = vmatprep.subr.bf16.mxu1 %v441_v6  ;;  %v449_v11 = vld [vmem:[#allocation5 + $0x40] ss:$16 sps:$4 sm:$0xff]   ;;  %v450_v12 = vld [vmem:[#allocation5 + $0x48] ss:$16 sps:$4 sm:$0xff]   ;;  %v451_v13 = vld [vmem:[#allocation5 + $0x64] ss:$16 sps:$4 sm:$0xff]  }
  0x3c   :  { %v453_v14 = vld [vmem:[#allocation5 + $0x6c] ss:$16 sps:$4 sm:$0xff]   ;;  %v455_v15 = vld [vmem:[#allocation5 + $0x60] ss:$16 sps:$4 sm:$0xff]   ;;  %v456_v16 = vld [vmem:[#allocation5 + $0x68] ss:$16 sps:$4 sm:$0xff]  }
  0x3d   :  { %v457_v17 = vld [vmem:[#allocation5 + $0x84] ss:$16 sps:$4 sm:$0xff]   ;;  %v459_v18 = vld [vmem:[#allocation5 + $0x8c] ss:$16 sps:$4 sm:$0xff]   ;;  %v461_v19 = vld [vmem:[#allocation5 + $0x80] ss:$16 sps:$4 sm:$0xff]  }
  0x3e   :  { %280 = vmatpush1.bf16.msra.mxu0 %v443_v7  ;;  %323 = vmatpush1.bf16.msra.mxu1 %v444_v8  ;;  %v462_v20 = vld [vmem:[#allocation5 + $0x88] ss:$16 sps:$4 sm:$0xff]   ;;  %v463_v21 = vld [vmem:[#allocation5 + $0xa4] ss:$16 sps:$4 sm:$0xff]   ;;  %v465_v22 = vld [vmem:[#allocation5 + $0xac] ss:$16 sps:$4 sm:$0xff]  }
  0x3f   :  { %281 = vmatprep.subr.bf16.mxu0 %v445_v9  ;;  %324 = vmatprep.subr.bf16.mxu1 %v447_v10  ;;  %v467_v23 = vld [vmem:[#allocation5 + $0xa0] ss:$16 sps:$4 sm:$0xff]   ;;  %v468_v24 = vld [vmem:[#allocation5 + $0xa8] ss:$16 sps:$4 sm:$0xff]   ;;  %v469_v25 = vld [vmem:[#allocation5 + $0xc4] ss:$16 sps:$4 sm:$0xff]  }
  0x40   :  { %v471_v26 = vld [vmem:[#allocation5 + $0xcc] ss:$16 sps:$4 sm:$0xff]   ;;  %v473_v27 = vld [vmem:[#allocation5 + $0xc0] ss:$16 sps:$4 sm:$0xff]   ;;  %v474_v28 = vld [vmem:[#allocation5 + $0xc8] ss:$16 sps:$4 sm:$0xff]  }
  0x41   :  { %v475_v29 = vld [vmem:[#allocation5 + $0xe4] ss:$16 sps:$4 sm:$0xff]   ;;  %v477_v30 = vld [vmem:[#allocation5 + $0xec] ss:$16 sps:$4 sm:$0xff]   ;;  %v479_v31 = vld [vmem:[#allocation5 + $0xe0] ss:$16 sps:$4 sm:$0xff]  }
  0x42   :  { %282 = vmatpush1.bf16.msra.mxu0 %v449_v11  ;;  %325 = vmatpush1.bf16.msra.mxu1 %v450_v12  ;;  %v480_v32 = vld [vmem:[#allocation5 + $0xe8] ss:$16 sps:$4 sm:$0xff]   ;;  %v92_v35 = vshrl.u32 %v91_v34, 7  ;;  %v89_v38 = vld [vmem:[#allocation7] sm:$0xf]  ;;  %s584_s2 = smov [#allocation8]  }
  0x43   :  { %283 = vmatprep.subr.bf16.mxu0 %v451_v13  ;;  %326 = vmatprep.subr.bf16.mxu1 %v453_v14  ;;  %s376_s23 = sshll.u32 %s584_s2, 4  ;;  %s377_s23 = int_to_ptr.vmem [resolvable:$true] %s376_s23 }
  0x44   :  { %v93_v36 = vsub.s32 0, %v92_v35  ;;  %v101_v37 = vsub.s32 2, %v92_v35  ;;  %v97_v39 = vsub.s32 1, %v92_v35  ;;  %v105_v40 = vsub.s32 3, %v92_v35  ;;  %s548_s24 = scalar_lea.vmem %s377_s23, 1024  ;;  %p553_p11 = scmp.lt.s32.totalorder %s377_s23, %s377_s23 }
  0x45   :  { %p549_p10 = scmp.ne.s32.totalorder %s377_s23, %s548_s24  ;;  %p554_p12 = scmp.lt.s32.totalorder %s548_s24, %s548_s24 }
  0x46   :  { %284 = vmatpush1.bf16.msra.mxu0 %v455_v15  ;;  %327 = vmatpush1.bf16.msra.mxu1 %v456_v16  ;;  %v94_v41 = vrot.slane %v89_v38, %v93_v36  ;;  %v102_v42 = vrot.slane %v89_v38, %v101_v37  ;;  %v98_v43 = vrot.slane %v89_v38, %v97_v39 }
  0x47   :  { %285 = vmatprep.subr.bf16.mxu0 %v457_v17  ;;  %328 = vmatprep.subr.bf16.mxu1 %v459_v18  ;;  %v106_v44 = vrot.slane %v89_v38, %v105_v40  ;;  %p555_p13 = por %p554_p12, %p553_p11 }
  0x49   :  { %p556_p0 = pnand %p555_p13, %p549_p10 }
  0x4a   :  { %286 = vmatpush1.bf16.msra.mxu0 %v461_v19  ;;  %329 = vmatpush1.bf16.msra.mxu1 %v462_v20 }
  0x4b   :  { %287 = vmatprep.subr.bf16.mxu0 %v463_v21  ;;  %330 = vmatprep.subr.bf16.mxu1 %v465_v22 }
  0x4e   :  { %288 = vmatpush1.bf16.msra.mxu0 %v467_v23  ;;  %331 = vmatpush1.bf16.msra.mxu1 %v468_v24 }
  0x4f   :  { %289 = vmatprep.subr.bf16.mxu0 %v469_v25  ;;  %332 = vmatprep.subr.bf16.mxu1 %v471_v26 }
  0x52   :  { %290 = vmatpush1.bf16.msra.mxu0 %v473_v27  ;;  %333 = vmatpush1.bf16.msra.mxu1 %v474_v28 }
  0x53   :  { %291 = vmatprep.subr.bf16.mxu0 %v475_v29  ;;  %334 = vmatprep.subr.bf16.mxu1 %v477_v30 }
  0x56   :  { %292 = vmatpush1.bf16.msra.mxu0 %v479_v31  ;;  %335 = vmatpush1.bf16.msra.mxu1 %v480_v32 }
  0x59   :  { %310 = vmatmul.mubr.bf16.vlgmr.msra.gmra.mrb[0].mxu0 %v481_v33  ;;  %353 = vmatmul.mubr.bf16.vlgmr.msra.gmra.mrb[0].mxu1 %v481_v33 }
 0x12c   :  { %v311_v45 = vpop.f32.mrb[0].mxu0  ;;  %v354_v46 = vpop.f32.mrb[0].mxu1 }
 0x12d   :  { %v312_v47 = vadd.f32 %v311_v45, %v94_v41  ;;  %v355_v48 = vadd.f32 %v354_v46, %v102_v42  ;;  %v313_v49 = vpop.f32.mrb[1].mxu0  ;;  %v356_v50 = vpop.f32.mrb[1].mxu1 }
 0x12e   :  { %v314_v51 = vadd.f32 %v313_v49, %v98_v43  ;;  %v357_v52 = vadd.f32 %v356_v50, %v106_v44  ;;  %v315_v53 = vpop.f32.mrb[2].mxu0  ;;  %v358_v54 = vpop.f32.mrb[2].mxu1 }
 0x12f   :  { %363 = vst [vmem:[#allocation8] sm:$0xff] %v312_v47  ;;  %365 = vst [vmem:[#allocation8 + $0x10] sm:$0xff] %v355_v48  ;;  %v316_v55 = vadd.f32 %v315_v53, %v94_v41  ;;  %v359_v56 = vadd.f32 %v358_v54, %v102_v42  ;;  %v317_v57 = vpop.f32.mrb[3].mxu0  ;;  %v360_v58 = vpop.f32.mrb[3].mxu1 }
 0x130   :  { %364 = vst [vmem:[#allocation8 + $0x8] sm:$0xff] %v314_v51  ;;  %366 = vst [vmem:[#allocation8 + $0x18] sm:$0xff] %v357_v52  ;;  %v318_v59 = vadd.f32 %v317_v57, %v98_v43  ;;  %v361_v60 = vadd.f32 %v360_v58, %v106_v44 }
 0x131   :  { %367 = vst [vmem:[#allocation8 + $0x20] sm:$0xff] %v316_v55  ;;  %369 = vst [vmem:[#allocation8 + $0x30] sm:$0xff] %v359_v56 }
 0x132   :  { %368 = vst [vmem:[#allocation8 + $0x28] sm:$0xff] %v318_v59  ;;  %370 = vst [vmem:[#allocation8 + $0x38] sm:$0xff] %v361_v60 }
 0x133   :  { %559 = shalt.err (!%p556_p0)
}
 0x134   :  { %s560_s27 = scalar_lea.hbm %s658_s3, 1024 }
 0x135   :  { %p561_p1 = scmp.ne.s32.totalorder %s658_s3, %s560_s27  ;;  %p564_p2 = scmp.lt.u32.totalorder %s560_s27, %s658_s3 }
 0x137   :  { %p566_p3 = pnand %p564_p2, %p561_p1 }
 0x139   :  { %569 = shalt.err (!%p566_p3)
}
 0x13a   :  { %s585_s5 = smov 512   ;;  %s586_s6 = smov 32  }
 0x13b   :  { %382 = dma.vmem_to_hbm [thread:$0]  %s377_s23, 1024, %s658_s3, [#allocation4], %s585_s5, %s585_s5, %s586_s6  }
 0x13c   :  { %574 = dma.done.wait [#allocation4], 1024  }
 0x13d   :  { %575 = vsyncadd [#allocation4], 4294966272 }
 0x13e   :  { %386 = vsyncpa [#allocation3], 1 }
 0x13f   :  { %387 = vsyncpa [#allocation6], 1 }
 0x140   :  { %388 = vsyncpa [#allocation4], 1 }

// kernel: fairseq_encoder_decoder_forward.4
= control target key start
LH: loop header
LB: loop body
LE: loop exit
PB: predicated region body
PF: predicated region fallthrough
CT: control target
= control target key end

     0   :  { %s1042_s0 = inlined_call_operand.hbm [shape: s32[2], index: 0, kind: input, shape index: {}]   ;;  %s1043_s1 = inlined_call_operand.hbm [shape: bf16[2,8,128], index: 1, kind: input, shape index: {}]   ;;  %s1044_s2 = inlined_call_operand.hbm [shape: bf16[2,8,128], index: 2, kind: input, shape index: {}]   ;;  %s1045_s3 = inlined_call_operand.hbm [shape: bf16[2,8,128], index: 3, kind: output, shape index: {}]  }
   0x1   :  { %s605_s14 = scalar_lea.hbm %s1042_s0, 16 }
   0x2   :  { %p606_p0 = scmp.ne.s32.totalorder %s1042_s0, %s605_s14  ;;  %p609_p1 = scmp.lt.u32.totalorder %s605_s14, %s1042_s0 }
   0x4   :  { %p611_p2 = pnand %p609_p1, %p606_p0 }
   0x6   :  { %614 = shalt.err (!%p611_p2)  }
   0x7   :  { %s765_s19 = smov [#allocation6]  }
   0x8   :  { %9 = dma.hbm_to_smem %s1042_s0, 16, %s765_s19, [#allocation5] }
   0x9   :  { %727 = dma.done.wait [#allocation5], 16 }
   0xa   :  { %728 = vsyncadd [#allocation5], 4294967280 }
   0xb   :  { %11 = sfence }
   0xc   :  { %12 = vsyncpa [#allocation8], 0 }
   0xd   :  { %14 = vsyncpa [#allocation8 + $0x1], 0 }
   0xe   :  { %15 = vsyncpa [#allocation11], 0 }
   0xf   :  { %17 = vsyncpa [#allocation11 + $0x1], 0 }
  0x10   :  { %18 = vsyncpa [#allocation9], 0 }
  0x11   :  { %20 = vsyncpa [#allocation9 + $0x1], 0  ;;  %s805_s22 = smov 0   ;;  %s807_s23 = smov 0  }
  0x12   :  { %s809_s24 = smov 0   ;;  %s811_s25 = smov 0  }
  0x13   :  { %s813_s26 = smov 0   ;;  %s815_s0 = smov 0  }
  0x14 LB: > { %s492_s27 = sadd.s32 4294967295, %s763_s0   ;;  %s493_s28 = sadd.s32 4294967294, %s763_s0   ;;  %s763_s0 = sphi %s815_s0, %s26_s0   ;;  %s759_s26 = sphi %s813_s26, %s1065_s26   ;;  %s755_s25 = sphi %s811_s25, %s1064_s25   ;;  %s751_s24 = sphi %s809_s24, %s1063_s24   ;;  %s747_s23 = sphi %s807_s23, %s1062_s23   ;;  %s743_s22 = sphi %s805_s22, %s1061_s22  }
  0x15   : > { %s38_s29 = sadd.s32 1, %s759_s26  ;;  %s45_s30 = sadd.s32 1, %s751_s24 }
  0x16   : > { %p40_p3 = scmp.ge.s32.totalorder %s38_s29, 2  ;;  %p52_p4 = scmp.ne.s32.totalorder %s751_s24, %s747_s23 }
  0x17   : > { %p53_p5 = scmp.eq.s32.totalorder %s763_s0, 0  ;;  %p58_p6 = scmp.ne.s32.totalorder %s747_s23, %s743_s22 }
  0x18   : > { %s1067_s29 = smov (%p40_p3, %s38_s29), 0  ;;  %p59_p8 = scmp.eq.s32.totalorder %s492_s27, 0 }
  0x19   : > { %p846_p7 = por %p53_p5, %p52_p4  ;;  %s42_s5 = ssub.s32 %s759_s26, %s1067_s29 }
  0x1a   : > { %p110_p9 = scmp.eq.s32.totalorder %s492_s27, 1  ;;  %p43_p10 = scmp.eq.s32.totalorder %s42_s5, 0 }
  0x1b   : > { %p852_p11 = por %p59_p8, %p58_p6  ;;  %p116_p13 = scmp.eq.s32.totalorder %s493_s28, 1 }
  0x1c   : > { %p856_p12 = por %p110_p9, %p52_p4  ;;  %p542_p2 = scmp.lt.s32.totalorder %s763_s0, 2 }
  0x1d   : > { %s1049_s6 = scalar_select %p852_p11, 1, 0 }
  0x1e   : > { %s1050_s7 = scalar_select %p856_p12, 1, 0 }
  0x1f   : > { %s861_s8 = scalar_select %p43_p10, %s751_s24, %s45_s30  }
  0x20   : > { %p863_p0 = por %p116_p13, %p58_p6  ;;  %s870_s10 = sand.u32 1, %s751_s24  }
  0x21   : > { %s496_s11 = sshll.u32 %s870_s10, 2  ;;  %s497_s12 = sshll.u32 %s759_s26, 6 }
  0x22   : > { %s1051_s9 = scalar_select %p863_p0, 1, 0 }
  0x23   : > { %s879_s15 = scalar_lea.hbm %s1043_s1, %s497_s12  ;;  %s140_s16 = scalar_lea.vmem [#allocation7], %s496_s11 }
  0x24   : > { %s147_s17 = sshll.u32 %s140_s16, 4  ;;  %p887_p3 = pnand %p542_p2, %p846_p7  ;;  %s883_s17 = int_to_ptr.vmem [resolvable:$true] %s147_s17 }
  0x25   : > { %s137_s19 = scalar_lea.sflag [#allocation8], %s870_s10  ;;  %s615_s20 = scalar_lea.hbm %s879_s15, 64 }
  0x26   : > { %p616_p6 = scmp.ne.s32.totalorder %s879_s15, %s615_s20  ;;  %p617_p8 = pneg %p887_p3 }
  0x27   : > { %s620_s28 = scalar_lea.hbm %s1043_s1, 128  ;;  %p621_p7 = scmp.lt.u32.totalorder %s879_s15, %s1043_s1 }
  0x28   : > { %p618_p9 = pnand %p617_p8, %p616_p6  ;;  %p622_p13 = scmp.lt.u32.totalorder %s620_s28, %s615_s20 }
  0x29   : > { %p624_p1 = scmp.lt.u32.totalorder %s615_s20, %s879_s15 }
  0x2a   : > { %p619_p10 = pneg %p618_p9  ;;  %p623_p2 = por %p622_p13, %p621_p7 }
  0x2c   : > { %p625_p4 = por %p624_p1, %p623_p2 }
  0x2e   : > { %p626_p5 = pnand %p625_p4, %p619_p10 }
  0x30   : > { %629 = shalt.err (!%p626_p5)
}
  0x31   : > { %s630_s5 = scalar_lea.vmem %s883_s17, 64  ;;  %s766_s13 = smov [#allocation7]  }
  0x32   : > { %p631_p6 = scmp.ne.s32.totalorder %s883_s17, %s630_s5  ;;  %s635_s14 = sshll.u32 %s766_s13, 4  ;;  %s636_s14 = int_to_ptr.vmem [resolvable:$false] %s635_s14 }
  0x33   : > { %s637_s16 = scalar_lea.vmem %s636_s14, 128  ;;  %p638_p12 = scmp.lt.s32.totalorder %s883_s17, %s636_s14 }
  0x34   : > { %p633_p9 = pnand %p631_p6, %p617_p8  ;;  %p639_p7 = scmp.lt.s32.totalorder %s637_s16, %s630_s5 }
  0x36   : > { %p634_p0 = pneg %p633_p9  ;;  %p640_p13 = por %p639_p7, %p638_p12 }
  0x38   : > { %p641_p1 = pnand %p640_p13, %p634_p0 }
  0x3a   : > { %644 = shalt.err (!%p641_p1)
}
  0x3b   : > { %534 = dma.hbm_to_vmem [thread:$0]  (!%p887_p3), %s879_s15, 64, %s883_s17, %s137_s19  }
  0x3c   : > { %p1053_p4 = scmp.lt.s32.totalorder %s763_s0, 3  ;;  %p1054_p5 = scmp.ge.s32.totalorder %s763_s0, 1 }
  0x3d   : > { %s932_s28 = scalar_lea.hbm %s1044_s2, %s497_s12  ;;  %s158_s30 = scalar_lea.vmem [#allocation10], %s496_s11 }
  0x3e   : > { %p923_p10 = pnand %p1054_p5, %p1053_p4  ;;  %s166_s4 = sshll.u32 %s158_s30, 4  ;;  %s167_s4 = int_to_ptr.vmem [resolvable:$true] %s166_s4 }
  0x3f   : > { %s155_s15 = scalar_lea.sflag [#allocation11], %s870_s10  ;;  %s645_s17 = scalar_lea.hbm %s932_s28, 64 }
  0x40   : > { %s1055_s20 = scalar_select %p923_p10, 1, 0 }
  0x41   : > { %p646_p12 = scmp.ne.s32.totalorder %s932_s28, %s645_s17  ;;  %s650_s12 = scalar_lea.hbm %s1044_s2, 128 }
  0x42   : > { %p651_p6 = scmp.lt.u32.totalorder %s932_s28, %s1044_s2  ;;  %p652_p9 = scmp.lt.u32.totalorder %s650_s12, %s645_s17 }
  0x43   : > { %p648_p0 = pnand %p646_p12, %p617_p8  ;;  %p654_p13 = scmp.lt.u32.totalorder %s645_s17, %s932_s28 }
  0x44   : > { %p653_p7 = por %p652_p9, %p651_p6 }
  0x45   : > { %p649_p2 = pneg %p648_p0 }
  0x46   : > { %p655_p1 = por %p654_p13, %p653_p7 }
  0x48   : > { %p656_p4 = pnand %p655_p1, %p649_p2 }
  0x4a   : > { %659 = shalt.err (!%p656_p4)
}
  0x4b   : > { %s660_s10 = scalar_lea.vmem %s167_s4, 64  ;;  %s767_s11 = smov [#allocation10]  }
  0x4c   : > { %p661_p5 = scmp.ne.s32.totalorder %s167_s4, %s660_s10  ;;  %s665_s16 = sshll.u32 %s767_s11, 4  ;;  %s666_s16 = int_to_ptr.vmem [resolvable:$false] %s665_s16 }
  0x4d   : > { %s667_s21 = scalar_lea.vmem %s666_s16, 128  ;;  %p668_p11 = scmp.lt.s32.totalorder %s167_s4, %s666_s16 }
  0x4e   : > { %p663_p12 = pnand %p661_p5, %p617_p8  ;;  %p669_p10 = scmp.lt.s32.totalorder %s667_s21, %s660_s10 }
  0x50   : > { %p664_p0 = pneg %p663_p12  ;;  %p670_p6 = por %p669_p10, %p668_p11 }
  0x52   : > { %p671_p9 = pnand %p670_p6, %p664_p0 }
  0x54   : > { %674 = shalt.err (!%p671_p9)
}
  0x55   : > { %537 = dma.hbm_to_vmem [thread:$0]  (!%p887_p3), %s932_s28, 64, %s167_s4, %s155_s15  }
  0x56   : > { %p1056_p2 = scmp.ne.s32.totalorder %s1055_s20, 0 }
  0x57   : > { %s959_s27 = sand.u32 (!%p1056_p2), 1, %s747_s23   ;;  %p1057_p11 = scmp.ne.s32.totalorder (!%p1056_p2), %s1049_s6, 0 }
  0x58   : > { %175 = sbr.rel (%p1056_p2) target bundleno = 923 (0x39b), region = 28  ;;  %s962_s30 = sshll.u32 (!%p1056_p2), %s959_s27, 2 }
  0x59   : > { %s178_s17 = scalar_lea.sflag (!%p1056_p2), [#allocation8], %s959_s27  ;;  %s181_s19 = scalar_lea.vmem (!%p1056_p2), [#allocation7], %s962_s30 }
  0x5f   : > { %730 = dma.done.wait (%p1057_p11), %s178_s17, 64  }
  0x60   : > { %732 = vsyncadd (%p1057_p11), %s178_s17, 4294967232  ;;  %s187_s18 = scalar_lea.sflag [#allocation11], %s959_s27  ;;  %s190_s20 = scalar_lea.vmem [#allocation10], %s962_s30 }
  0x61   : > { %734 = dma.done.wait (%p1057_p11), %s187_s18, 64  }
  0x62   : > { %736 = vsyncadd (%p1057_p11), %s187_s18, 4294967232  ;;  %vm221_vm0 = vcmask 7168   ;;  %v768_v0 = vmov 0.0   ;;  %vm769_vm1 = vmmov 0   ;;  %v226_v1 = vld [vmem:[%s190_s20] sm:$0xf]  ;;  %v269_v4 = vlaneseq }
  0x63   : > { %223 = vst.msk [vmem:[#allocation3] sm:$0xff] %vm221_vm0, %v768_v0  ;;  %513 = vmatprep.subr.bf16.mxu0 %v768_v0  ;;  %515 = vmatprep.mubr.msk.bf16.mxu0 %vm769_vm1, %v768_v0  ;;  %v977_v2 = vld [vmem:[%s181_s19] sm:$0xf]  ;;  %v770_v3 = vmov -inf   ;;  %s273_s6 = sld [smem:[#allocation6 + %s755_s25]]  ;;  %vm278_vm3 = vcmask 64512  }
  0x64   : > { %519 = vmatprep.subr.bf16.mxu1 %v768_v0  ;;  %521 = vmatprep.mubr.msk.bf16.mxu1 %vm769_vm1, %v768_v0  ;;  %222 = vst.msk [vmem:[#allocation2] sm:$0xff] %vm221_vm0, %v770_v3  ;;  %v270_v5 = vand.u32 127, %v269_v4  ;;  %v771_v14 = vmov 0   ;;  %vm313_vm4 = vcmask 1043456   ;;  %v372_v40 = vunpack.c.l.bf16 %v977_v2  ;;  %s506_s28 = sshll.u32 %s755_s25, 6  ;;  %s215_s4 = scalar_lea.vmem [#allocation12], %s962_s30 }
  0x65   : > { %514 = vmatpush3.bf16.xpose.msra.mxu0 %v226_v1  ;;  %597 = vset.pattern.permute.xlu0 %v771_v14  ;;  %v315_v19 = vsel %vm313_vm4, %v226_v1, 0  ;;  %s390_s15 = sshll.u32 %s215_s4, 4  ;;  %s993_s13 = scalar_lea.hbm %s1045_s3, %s506_s28  ;;  %s995_s15 = int_to_ptr.vmem [resolvable:$true] %s390_s15 }
  0x66   : > { %598 = vset.pattern.permute.xlu1 %v771_v14  ;;  %520 = vmatpush3.bf16.msra.mxu1 %v315_v19  ;;  %s377_s14 = scalar_lea.sflag [#allocation9], %s959_s27  ;;  %s675_s10 = scalar_lea.vmem %s995_s15, 64 }
  0x67   : > { %p676_p3 = scmp.ne.s32.totalorder %s995_s15, %s675_s10  ;;  %p1058_p8 = scmp.ne.s32.totalorder %s1050_s7, 0 }
  0x68   : > { %s772_s25 = smov [#allocation12]  }
  0x69   : > { %v274_v6 = vstv %s273_s6  ;;  %p677_p10 = pnand %p676_p3, %p1058_p8  ;;  %s679_s11 = sshll.u32 %s772_s25, 4  ;;  %s680_s11 = int_to_ptr.vmem [resolvable:$false] %s679_s11 }
  0x6a   : > { %vm275_vm2 = vcmp.lt.s32.totalorder %v270_v5, %v274_v6  ;;  %v294_v28 = vld [vmem:[#allocation3] sm:$0xff]  ;;  %s681_s16 = scalar_lea.vmem %s680_s11, 128  ;;  %p682_p13 = scmp.lt.s32.totalorder %s995_s15, %s680_s11 }
  0x6b   : > { %v277_v15 = vld [vmem:[#allocation2] sm:$0xff]  ;;  %p678_p7 = pneg %p677_p10  ;;  %p683_p1 = scmp.lt.s32.totalorder %s681_s16, %s675_s10 }
  0x6c   : > { %516 = vmatmul.mubr.bf16.vlgmr.msra.gmra.mrb[0].mxu0 %v977_v2 }
  0x6d   : > { %p684_p4 = por %p683_p1, %p682_p13 }
  0x6f   : > { %p685_p5 = pnand %p684_p4, %p678_p7 }
 0x13f   : > { %v261_v7 = vpop.f32.mrb[0].mxu0 }
 0x140   : > { %v267_v8 = vmul.f32 0.088388346, %v261_v7  ;;  %v517_v9 = vpop.f32.mrb[1].mxu0 }
 0x141   : > { %v264_v10 = vpop.f32.mrb[2].mxu0 }
 0x142   : > { %v518_v11 = vpop.f32.mrb[3].mxu0  ;;  %v276_v12 = vsel %vm275_vm2, %v267_v8, -1e+09 }
 0x143   : > { %v279_v13 = vsel %vm278_vm3, %v276_v12, -inf }
 0x144   : > { %280 = vmax.xlane.f32.xlu0 %v279_v13 }
 0x1d1   : > { %v281_v16 = vpop.xlane.xlu0 %280 }
 0x1d2   : > { %v282_v17 = vmax.f32 %v277_v15, %v281_v16 }
 0x1d4   : > { %v283_v18 = vsub.f32 %v277_v15, %v282_v17  ;;  %359 = vst.msk [vmem:[#allocation2] sm:$0xff] %vm221_vm0, %v282_v17  ;;  %288 = vperm.xlu0 %597, %v282_v17  }
 0x1d6   : > { %v284_v26 = vmul.f32 1.442695, %v283_v18 }
 0x253   : > { %v289_v20 = vpop.permute.xlu0 %288 }
 0x254   : > { %v291_v21 = vsub.f32 %v276_v12, %v289_v20 }
 0x256   : > { %v292_v22 = vmul.f32 1.442695, %v291_v21 }
 0x258   : > { %599 = vpow2.f32 %v292_v22 }
 0x259   : > { %601 = vpow2.f32 %v284_v26 }
 0x262   : > { %v600_v23 = vpop.eup %599 }
 0x263   : > { %v296_v24 = vsel %vm278_vm3, %v600_v23, 0.0  ;;  %v309_v25 = vpack.c.bf16 %v600_v23, %v600_v23  ;;  %v602_v27 = vpop.eup %601 }
 0x264   : > { %297 = vadd.xlane.f32.xlu1 %v296_v24  ;;  %v295_v29 = vmul.f32 %v602_v27, %v294_v28 }
 0x265   : > { %522 = vmatmul.mubr.msk.bf16.vlgmr.msra.gmra.mrb[0].mxu1 %vm278_vm3, %v309_v25 }
 0x275   : > { %305 = vperm.xlu1 %598, %v602_v27  }
 0x2f1   : > { %v298_v30 = vpop.xlane.xlu1 %297 }
 0x2f2   : > { %v299_v31 = vadd.f32 %v298_v30, %v295_v29 }
 0x2f4   : > { %301 = vst.msk [vmem:[#allocation3] sm:$0xff] %vm221_vm0, %v299_v31 }
 0x2f5   : > { %v306_v38 = vpop.permute.xlu1 %305 }
 0x2f6   : > { %v308_v39 = vmul.f32 0.0, %v306_v38 }
 0x2fb   : > { %v364_v32 = vld [vmem:[#allocation3] sm:$0xff] }
 0x2fc   : > { %603 = vrcp.f32 %v364_v32 }
 0x306   : > { %v604_v33 = vpop.eup %603 }
 0x307   : > { %368 = vperm.xlu1 %598, %v604_v33  }
 0x338   : > { %v351_v34 = vpop.f32.mrb[0].mxu1 }
 0x339   : > { %v523_v35 = vpop.f32.mrb[1].mxu1  ;;  %v357_v41 = vadd.f32 %v351_v34, %v308_v39 }
 0x33a   : > { %v354_v36 = vpop.f32.mrb[2].mxu1 }
 0x33b   : > { %v524_v37 = vpop.f32.mrb[3].mxu1 }
 0x386   : > { %v369_v42 = vpop.permute.xlu1 %368 }
 0x387   : > { %v371_v43 = vmul.f32 %v369_v42, %v357_v41 }
 0x389   : > { %v373_v44 = vadd.f32 %v372_v40, %v371_v43 }
 0x38b   : > { %v374_v45 = vpack.c.bf16 %v373_v44, %v373_v44 }
 0x38d   : > { %375 = vst [vmem:[%s215_s4] sm:$0xf] %v374_v45 }
 0x38e   : > { %688 = shalt.err (!%p685_p5)
}
 0x38f   : > { %s689_s21 = scalar_lea.hbm %s993_s13, 64  ;;  %s693_s17 = scalar_lea.hbm %s1045_s3, 128 }
 0x390   : > { %p690_p12 = scmp.ne.s32.totalorder %s993_s13, %s689_s21  ;;  %p694_p9 = scmp.lt.u32.totalorder %s993_s13, %s1045_s3 }
 0x391   : > { %p695_p2 = scmp.lt.u32.totalorder %s693_s17, %s689_s21  ;;  %p697_p3 = scmp.lt.u32.totalorder %s689_s21, %s993_s13 }
 0x392   : > { %p691_p0 = pnand %p690_p12, %p1058_p8 }
 0x393   : > { %p696_p11 = por %p695_p2, %p694_p9 }
 0x394   : > { %p692_p6 = pneg %p691_p0 }
 0x395   : > { %p698_p10 = por %p697_p3, %p696_p11 }
 0x397   : > { %p699_p7 = pnand %p698_p10, %p692_p6 }
 0x399   : > { %702 = shalt.err (!%p699_p7)
}
 0x39a   : > { %529 = dma.vmem_to_hbm [thread:$0]  (%p1058_p8), %s995_s15, 64, %s993_s13, %s377_s14  }
 0x39b PF: > { %s402_s20 = sand.u32 1, %s743_s22   ;;  %p1059_p13 = scmp.ne.s32.totalorder %s1051_s9, 0 }
 0x39c   : > { %p1060_p1 = scmp.ge.s32.totalorder %s763_s0, 2  ;;  %s403_s6 = scalar_lea.sflag [#allocation9], %s402_s20 }
 0x39e   : > { %p539_p4 = pnand %p1060_p1, %p1059_p13 }
 0x3a0   : > { %738 = dma.done.wait (!%p539_p4), %s403_s6, 64  }
 0x3a1   : > { %740 = vsyncadd (!%p539_p4), %s403_s6, 4294967232  ;;  %s26_s0 = sadd.s32 1, %s763_s0   ;;  %s1061_s22 = smov %s747_s23 }
 0x3a2   : > { %p23_p5 = scmp.ge.s32.totalorder %s26_s0, 4   ;;  %s1062_s23 = smov %s751_s24 }
 0x3a3   : > { %s1063_s24 = smov %s861_s8  ;;  %s1064_s25 = smov %s759_s26 }
 0x3a4   : > { %s1065_s26 = smov %s1067_s29  ;;  %25 = sbr.rel (!%p23_p5) target bundleno = 20 (0x14), region = 94 }
 0x3ab   :  { %408 = vsyncpa [#allocation8], 1 }
 0x3ac   :  { %410 = vsyncpa [#allocation8 + $0x1], 1 }
 0x3ad   :  { %411 = vsyncpa [#allocation11], 1 }
 0x3ae   :  { %413 = vsyncpa [#allocation11 + $0x1], 1 }
 0x3af   :  { %414 = vsyncpa [#allocation9], 1 }
 0x3b0   :  { %416 = vsyncpa [#allocation9 + $0x1], 1 }

</bundles_post_ra>
